<compile_context>
chip_gen: v6e
topology: v6e:2x2x1
jax: 0.10.0
libtpu: 0.0.40
codegen_flags: <defaults>
</compile_context>

<pallas_src>
import functools

import jax
import jax.numpy as jnp
from jax import lax
from jax.experimental import pallas as pl
from jax.experimental.pallas import tpu as pltpu


_LANE = 128      # TPU lane width
_SUBLANE = 8
_TB_MAX = 512    # max packed-batch rows per grid tile (keeps several pipeline
                 # steps while sitting near the HBM roofline)


def _round_up(n, m):
    return ((n + m - 1) // m) * m


def _leaky_relu(x, slope=0.2):
    return jnp.where(x >= 0, x, slope * x)


def _vmem_capacity_bytes():
    """Per-TensorCore physical VMEM; conservative fallback = v7x (64 MiB)."""
    try:
        cap = getattr(pltpu.get_tpu_info(), "vmem_capacity_bytes", None)
        if cap:
            return int(cap)
    except Exception:
        pass
    return 64 * 1024 * 1024


def discriminator_kernel(x_ref, w1_ref, b1_ref, w2_ref, b2_ref, w3_ref, b3_ref,
                         out_ref):
    """One batch tile of the fused 3-layer MLP.

    x_ref:   (TB, pacdim)  f32   packed input rows (blocked over batch)
    w1_ref:  (pacdim, H1p) bf16  }
    b1_ref:  (1, H1p)      f32   } whole-array operands, single copy resident
    w2_ref:  (H1p, H2p)    bf16  } in VMEM for the lifetime of the grid
    b2_ref:  (1, H2p)      f32   }
    w3_ref:  (1, H2p)      f32   }
    b3_ref:  (1, 1)        f32   scalar in SMEM
    out_ref: (1, TB)       f32   lane-dense output row for this batch tile
    """
    # bf16 cast happens on-chip; x crosses HBM->VMEM as f32 exactly once.
    x = x_ref[...].astype(jnp.bfloat16)

    # Layer 1: Linear -> LeakyReLU(0.2)   (Dropout(0.5) == identity, eval mode)
    h = jnp.dot(x, w1_ref[...], preferred_element_type=jnp.float32)
    h = _leaky_relu(h + b1_ref[...])

    # Layer 2: Linear -> LeakyReLU(0.2)
    h = jnp.dot(h.astype(jnp.bfloat16), w2_ref[...],
                preferred_element_type=jnp.float32)
    h = _leaky_relu(h + b2_ref[...])

    # Final Linear(H2 -> 1), emitted lane-dense: contract w3 (1, H2p) with
    # h (TB, H2p) over the feature axis -> (1, TB) row (f32 MXU; negligible
    # cost and avoids a (TB, 1) column of masked narrow stores).
    o = lax.dot_general(w3_ref[...], h,
                        dimension_numbers=(((1,), (1,)), ((), ())),
                        preferred_element_type=jnp.float32)
    out_ref[...] = o + b3_ref[0, 0]


def prepare_params(params):
    """Pad feature dims to lane multiples and cast matmul weights to bf16.

    Done ONCE, outside the jitted per-call forward.  Zero-padding is
    bit-identical: padded lanes contribute exactly 0 to every dot product.
    """
    w1, b1, w2, b2, w3, b3 = params
    pacdim, h1 = w1.shape
    h2 = w2.shape[1]
    H1p = _round_up(h1, _LANE)
    H2p = _round_up(h2, _LANE)
    w1p = jnp.pad(w1, ((0, 0), (0, H1p - h1))).astype(jnp.bfloat16)
    b1p = jnp.pad(jnp.asarray(b1, jnp.float32).reshape(1, h1),
                  ((0, 0), (0, H1p - h1)))
    w2p = jnp.pad(w2, ((0, H1p - h1), (0, H2p - h2))).astype(jnp.bfloat16)
    b2p = jnp.pad(jnp.asarray(b2, jnp.float32).reshape(1, h2),
                  ((0, 0), (0, H2p - h2)))
    w3p = jnp.pad(jnp.asarray(w3, jnp.float32).reshape(1, h2),
                  ((0, 0), (0, H2p - h2)))
    b3p = jnp.asarray(b3, jnp.float32).reshape(1, 1)
    return w1p, b1p, w2p, b2p, w3p, b3p


@functools.partial(jax.jit, static_argnames=("pac",))
def discriminator_forward(x, prepared_params, pac):
    """x: (B, input_dim) f32 with B % pac == 0.  Returns (B // pac, 1) f32."""
    B, input_dim = x.shape
    if B % pac != 0:
        raise ValueError("batch size must be divisible by pac")
    pacdim = input_dim * pac
    Bp = B // pac
    x_packed = x.reshape(Bp, pacdim)          # == input_.view(-1, pacdim); free

    w1p, b1p, w2p, b2p, w3p, b3p = prepared_params
    if w1p.shape[0] != pacdim:
        raise ValueError("params were prepared for a different input_dim * pac")
    H1p = w1p.shape[1]
    H2p = w2p.shape[1]

    # ---- VMEM-aware batch-tile selection --------------------------------
    kp_lanes = _round_up(pacdim, _LANE)                 # physical lanes per x row
    resident = (_round_up(pacdim, 16) * H1p * 2         # w1 (bf16, single copy)
                + _round_up(H1p, 16) * H2p * 2          # w2 (bf16, single copy)
                + _SUBLANE * (H1p + 2 * H2p) * 4)       # b1, b2, w3 (f32 rows)
    # per packed row: double-buffered f32 x tile + f32/bf16 intermediates
    per_row = 2 * 4 * kp_lanes + 6 * (H1p + H2p) + 64
    vmem_budget = (_vmem_capacity_bytes() * 3) // 4     # headroom for scratch

    if Bp <= _LANE:
        tb = Bp                                         # tiny batch: one tile
    else:
        avail = max(vmem_budget - resident, per_row * _LANE)
        tb = min(_TB_MAX, avail // per_row)
        # >= 2 tiles so the "parallel" grid axis can feed both v7x TensorCores
        tb = min(tb, _round_up(-(-Bp // 2), _LANE))
        # lane-multiple tiles -> dense (unmasked) output stores
        tb = max((tb // _LANE) * _LANE, _LANE)
    num_tiles = pl.cdiv(Bp, tb)

    vmem_needed = resident + per_row * tb + (2 << 20)
    vmem_limit = min(max(vmem_needed, 32 * 1024 * 1024), vmem_budget)

    # ---- cost estimate: what the kernel actually reads / executes -------
    flops = 2 * Bp * (pacdim * H1p + H1p * H2p + H2p)
    bytes_accessed = (x_packed.size * 4 + w1p.size * 2 + w2p.size * 2
                      + (b1p.size + b2p.size + w3p.size + b3p.size) * 4
                      + Bp * 4)

    out_row = pl.pallas_call(
        discriminator_kernel,
        out_shape=jax.ShapeDtypeStruct((1, Bp), jnp.float32),
        grid=(num_tiles,),
        in_specs=[
            # x: batch-tiled f32 straight from HBM (no padded/bf16 HBM copy).
            pl.BlockSpec((tb, pacdim), lambda i: (i, 0)),
            # weights/biases: whole-array, single copy resident in VMEM
            # (outside the grid pipeline -> no double buffer, no re-DMA).
            pl.BlockSpec(memory_space=pltpu.MemorySpace.VMEM),   # w1
            pl.BlockSpec(memory_space=pltpu.MemorySpace.VMEM),   # b1
            pl.BlockSpec(memory_space=pltpu.MemorySpace.VMEM),   # w2
            pl.BlockSpec(memory_space=pltpu.MemorySpace.VMEM),   # b2
            pl.BlockSpec(memory_space=pltpu.MemorySpace.VMEM),   # w3
            pl.BlockSpec(memory_space=pltpu.MemorySpace.SMEM),   # b3 scalar
        ],
        out_specs=pl.BlockSpec((1, tb), lambda i: (0, i)),
        compiler_params=pltpu.CompilerParams(
            dimension_semantics=("parallel",),      # v7x: tiles across 2 TCs
            vmem_limit_bytes=int(vmem_limit),
        ),
        cost_estimate=pl.CostEstimate(
            flops=int(flops), transcendentals=0,
            bytes_accessed=int(bytes_accessed)),
    )(x_packed, w1p, b1p, w2p, b2p, w3p, b3p)

    return out_row.reshape(Bp, 1)


def init_params(key, input_dim, discriminator_dim, pac):
    """Deterministic PyTorch-style Linear init (uniform +/- 1/sqrt(fan_in)).

    Weights stored already transposed: (in_features, out_features).
    Biases stored as (1, out_features).
    """
    dims = [input_dim * pac] + list(discriminator_dim) + [1]
    params = []
    for i in range(len(dims) - 1):
        fan_in, fan_out = dims[i], dims[i + 1]
        key, kw, kb = jax.random.split(key, 3)
        bound = 1.0 / (fan_in ** 0.5)
        w = jax.random.uniform(kw, (fan_in, fan_out), jnp.float32, -bound, bound)
        b = jax.random.uniform(kb, (1, fan_out), jnp.float32, -bound, bound)
        params += [w, b]
    return tuple(params)


if __name__ == "__main__":
    pac = 10
    input_dim = 8
    discriminator_dim = (32, 32)

    key = jax.random.PRNGKey(0)
    k_x, k_p, k_x2 = jax.random.split(key, 3)
    params = init_params(k_p, input_dim, discriminator_dim, pac)
    prepared = prepare_params(params)   # pad/cast once, outside the GAN loop

    def reference_matched(x):
        # Precision-matched reference: bf16 matmul inputs, f32 accumulation,
        # f32 elementwise, f32 final layer (mirrors the kernel's policy).
        w1, b1, w2, b2, w3, b3 = params
        xr = x.reshape(-1, input_dim * pac)
        h = jnp.dot(xr.astype(jnp.bfloat16), w1.astype(jnp.bfloat16),
                    preferred_element_type=jnp.float32) + b1
        h = jnp.where(h >= 0, h, 0.2 * h)
        h = jnp.dot(h.astype(jnp.bfloat16), w2.astype(jnp.bfloat16),
                    preferred_element_type=jnp.float32) + b2
        h = jnp.where(h >= 0, h, 0.2 * h)
        return jnp.dot(h, w3, precision=lax.Precision.HIGHEST) + b3

    def reference_f32(x):
        # True f32 (PyTorch-like) reference; the bf16-MXU kernel typically
        # agrees to ~1e-3..1e-2 absolute at these scales (documented).
        w1, b1, w2, b2, w3, b3 = params
        xr = x.reshape(-1, input_dim * pac)
        h = jnp.dot(xr, w1, precision=lax.Precision.HIGHEST) + b1
        h = jnp.where(h >= 0, h, 0.2 * h)
        h = jnp.dot(h, w2, precision=lax.Precision.HIGHEST) + b2
        h = jnp.where(h >= 0, h, 0.2 * h)
        return jnp.dot(h, w3, precision=lax.Precision.HIGHEST) + b3

    # 1) tiny batch: single-tile path (TB == Bp)
    batch = 40
    x = jax.random.normal(k_x, (batch, input_dim), jnp.float32)
    out = jax.block_until_ready(discriminator_forward(x, prepared, pac))
    assert out.shape == (batch // pac, 1), out.shape
    assert jnp.allclose(out, reference_matched(x), atol=5e-3, rtol=5e-3)
    assert jnp.allclose(out, reference_f32(x), atol=5e-2, rtol=5e-2)

    # 2) larger batch: multi-tile grid (2 x 256-row tiles, ragged last tile)
    batch2 = 3000
    x2 = jax.random.normal(k_x2, (batch2, input_dim), jnp.float32)
    out2 = jax.block_until_ready(discriminator_forward(x2, prepared, pac))
    assert out2.shape == (batch2 // pac, 1), out2.shape
    assert jnp.allclose(out2, reference_matched(x2), atol=5e-3, rtol=5e-3)

    print("KERNEL_OK")
</pallas_src>

<mosaic_0001>
module attributes {stable_mosaic.version = 11 : i64} {
  func.func @discriminator_kernel(%arg0: i32, %arg1: memref<4x80xf32, #tpu.memory_space<vmem>>, %arg2: memref<80x128xbf16, #tpu.memory_space<vmem>>, %arg3: memref<1x128xf32, #tpu.memory_space<vmem>>, %arg4: memref<128x128xbf16, #tpu.memory_space<vmem>>, %arg5: memref<1x128xf32, #tpu.memory_space<vmem>>, %arg6: memref<1x128xf32, #tpu.memory_space<vmem>>, %arg7: memref<1x1xf32, #tpu.memory_space<smem>>, %arg8: memref<1x4xf32, #tpu.memory_space<vmem>>) attributes {dimension_semantics = [#tpu.dimension_semantics<parallel>], iteration_bounds = array<i64: 1>, scalar_prefetch = 0 : i64, scratch_operands = 0 : i64, tpu.core_type = #tpu.core_type<tc>, window_params = [{transform_indices = @transform_0, window_bounds = array<i64: 4, 80>}, {pipeline_mode = #tpu.pipeline_mode<synchronous>, transform_indices = @transform_1, window_bounds = array<i64: 80, 128>}, {pipeline_mode = #tpu.pipeline_mode<synchronous>, transform_indices = @transform_2, window_bounds = array<i64: 1, 128>}, {pipeline_mode = #tpu.pipeline_mode<synchronous>, transform_indices = @transform_3, window_bounds = array<i64: 128, 128>}, {pipeline_mode = #tpu.pipeline_mode<synchronous>, transform_indices = @transform_4, window_bounds = array<i64: 1, 128>}, {pipeline_mode = #tpu.pipeline_mode<synchronous>, transform_indices = @transform_5, window_bounds = array<i64: 1, 128>}, {transform_indices = @transform_6, window_bounds = array<i64: 1, 1>}, {transform_indices = @transform_7, window_bounds = array<i64: 1, 4>}]} {
    %c0 = arith.constant 0 : index
    %c0_0 = arith.constant 0 : index
    %0 = vector.load %arg1[%c0, %c0_0] : memref<4x80xf32, #tpu.memory_space<vmem>>, vector<4x80xf32>
    %1 = arith.truncf %0 : vector<4x80xf32> to vector<4x80xbf16>
    %c0_1 = arith.constant 0 : index
    %c0_2 = arith.constant 0 : index
    %2 = vector.load %arg2[%c0_1, %c0_2] : memref<80x128xbf16, #tpu.memory_space<vmem>>, vector<80x128xbf16>
    %cst = arith.constant dense<0.000000e+00> : vector<4x128xf32>
    %3 = tpu.matmul %1, %2, %cst {dimension_numbers = #tpu.dot_dimension_numbers<[1], [0], [0], [1], [0, 0, 1, 1], [], []>} : vector<4x80xbf16>, vector<80x128xbf16>, vector<4x128xf32> -> vector<4x128xf32>
    %c0_3 = arith.constant 0 : index
    %c0_4 = arith.constant 0 : index
    %4 = vector.load %arg3[%c0_3, %c0_4] : memref<1x128xf32, #tpu.memory_space<vmem>>, vector<1x128xf32>
    %5 = vector.broadcast %4 : vector<1x128xf32> to vector<4x128xf32>
    %6 = arith.addf %3, %5 : vector<4x128xf32>
    %cst_5 = arith.constant 0.000000e+00 : f32
    %7 = vector.broadcast %cst_5 : f32 to vector<4x128xf32>
    %8 = arith.cmpf oge, %6, %7 : vector<4x128xf32>
    %cst_6 = arith.constant 2.000000e-01 : f32
    %9 = vector.broadcast %cst_6 : f32 to vector<4x128xf32>
    %10 = arith.mulf %9, %6 : vector<4x128xf32>
    %11 = arith.select %8, %6, %10 : vector<4x128xi1>, vector<4x128xf32>
    %12 = arith.truncf %11 : vector<4x128xf32> to vector<4x128xbf16>
    %c0_7 = arith.constant 0 : index
    %c0_8 = arith.constant 0 : index
    %13 = vector.load %arg4[%c0_7, %c0_8] : memref<128x128xbf16, #tpu.memory_space<vmem>>, vector<128x128xbf16>
    %cst_9 = arith.constant dense<0.000000e+00> : vector<4x128xf32>
    %14 = tpu.matmul %12, %13, %cst_9 {dimension_numbers = #tpu.dot_dimension_numbers<[1], [0], [0], [1], [0, 0, 1, 1], [], []>} : vector<4x128xbf16>, vector<128x128xbf16>, vector<4x128xf32> -> vector<4x128xf32>
    %c0_10 = arith.constant 0 : index
    %c0_11 = arith.constant 0 : index
    %15 = vector.load %arg5[%c0_10, %c0_11] : memref<1x128xf32, #tpu.memory_space<vmem>>, vector<1x128xf32>
    %16 = vector.broadcast %15 : vector<1x128xf32> to vector<4x128xf32>
    %17 = arith.addf %14, %16 : vector<4x128xf32>
    %cst_12 = arith.constant 0.000000e+00 : f32
    %18 = vector.broadcast %cst_12 : f32 to vector<4x128xf32>
    %19 = arith.cmpf oge, %17, %18 : vector<4x128xf32>
    %cst_13 = arith.constant 2.000000e-01 : f32
    %20 = vector.broadcast %cst_13 : f32 to vector<4x128xf32>
    %21 = arith.mulf %20, %17 : vector<4x128xf32>
    %22 = arith.select %19, %17, %21 : vector<4x128xi1>, vector<4x128xf32>
    %c0_14 = arith.constant 0 : index
    %c0_15 = arith.constant 0 : index
    %23 = vector.load %arg6[%c0_14, %c0_15] : memref<1x128xf32, #tpu.memory_space<vmem>>, vector<1x128xf32>
    %cst_16 = arith.constant dense<0.000000e+00> : vector<1x4xf32>
    %24 = tpu.matmul %23, %22, %cst_16 {dimension_numbers = #tpu.dot_dimension_numbers<[1], [1], [0], [0], [0, 0, 1, 0], [], []>} : vector<1x128xf32>, vector<4x128xf32>, vector<1x4xf32> -> vector<1x4xf32>
    %c0_17 = arith.constant 0 : index
    %c0_18 = arith.constant 0 : index
    %25 = memref.load %arg7[%c0_17, %c0_18] : memref<1x1xf32, #tpu.memory_space<smem>>
    %26 = vector.broadcast %25 : f32 to vector<1x4xf32>
    %27 = arith.addf %24, %26 : vector<1x4xf32>
    %c0_19 = arith.constant 0 : index
    %c0_20 = arith.constant 0 : index
    %28 = vector.load %arg8[%c0_19, %c0_20] : memref<1x4xf32, #tpu.memory_space<vmem>>, vector<1x4xf32>
    tpu.vector_store %arg8[%c0_19, %c0_20], %27 {strides = array<i32>} : memref<1x4xf32, #tpu.memory_space<vmem>>, vector<1x4xf32>,
    return
  }
  func.func @transform_0(%arg0: i32) -> (i32, i32) {
    %c0_i32 = arith.constant 0 : i32
    %c0_i32_0 = arith.constant 0 : i32
    return %arg0, %c0_i32 : i32, i32
  }
  func.func @transform_1(%arg0: i32) -> (i32, i32) {
    %c0_i32 = arith.constant 0 : i32
    %c0_i32_0 = arith.constant 0 : i32
    %c0_i32_1 = arith.constant 0 : i32
    return %c0_i32, %c0_i32_0 : i32, i32
  }
  func.func @transform_2(%arg0: i32) -> (i32, i32) {
    %c0_i32 = arith.constant 0 : i32
    %c0_i32_0 = arith.constant 0 : i32
    %c0_i32_1 = arith.constant 0 : i32
    return %c0_i32, %c0_i32_0 : i32, i32
  }
  func.func @transform_3(%arg0: i32) -> (i32, i32) {
    %c0_i32 = arith.constant 0 : i32
    %c0_i32_0 = arith.constant 0 : i32
    %c0_i32_1 = arith.constant 0 : i32
    return %c0_i32, %c0_i32_0 : i32, i32
  }
  func.func @transform_4(%arg0: i32) -> (i32, i32) {
    %c0_i32 = arith.constant 0 : i32
    %c0_i32_0 = arith.constant 0 : i32
    %c0_i32_1 = arith.constant 0 : i32
    return %c0_i32, %c0_i32_0 : i32, i32
  }
  func.func @transform_5(%arg0: i32) -> (i32, i32) {
    %c0_i32 = arith.constant 0 : i32
    %c0_i32_0 = arith.constant 0 : i32
    %c0_i32_1 = arith.constant 0 : i32
    return %c0_i32, %c0_i32_0 : i32, i32
  }
  func.func @transform_6(%arg0: i32) -> (i32, i32) {
    %c0_i32 = arith.constant 0 : i32
    %c0_i32_0 = arith.constant 0 : i32
    %c0_i32_1 = arith.constant 0 : i32
    return %c0_i32, %c0_i32_0 : i32, i32
  }
  func.func @transform_7(%arg0: i32) -> (i32, i32) {
    %c0_i32 = arith.constant 0 : i32
    %c0_i32_0 = arith.constant 0 : i32
    return %c0_i32, %arg0 : i32, i32
  }
}

</mosaic_0001>

<bundles_post_ra>
// kernel: discriminator_forward.1
= control target key start
LH: loop header
LB: loop body
LE: loop exit
PB: predicated region body
PF: predicated region fallthrough
CT: control target
= control target key end

     0   :  { %13 = vsyncpa [#allocation4], 0  ;;  %s573_s0 = inlined_call_operand.vmem [shape: f32[4,80], index: 0, kind: input, shape index: {}]   ;;  %s574_s1 = inlined_call_operand.hbm [shape: bf16[80,128], index: 1, kind: input, shape index: {}]   ;;  %s575_s2 = inlined_call_operand.vmem [shape: f32[1,128], index: 2, kind: input, shape index: {}]   ;;  %s576_s3 = inlined_call_operand.vmem [shape: bf16[128,128], index: 3, kind: input, shape index: {}]   ;;  %s577_s4 = inlined_call_operand.vmem [shape: f32[1,128], index: 4, kind: input, shape index: {}]   ;;  %s578_s5 = inlined_call_operand.vmem [shape: f32[1,128], index: 5, kind: input, shape index: {}]   ;;  %s579_s6 = inlined_call_operand.<no memory space> [shape: f32[1,1], index: 6, kind: input, shape index: {}]   ;;  %s580_s7 = inlined_call_operand.hbm [shape: f32[1,4], index: 7, kind: output, shape index: {}]  }
   0x1   :  { %14 = vsyncpa [#allocation5], 0  ;;  %s479_s24 = smov [#allocation3]  }
   0x2   :  { %s22_s25 = sshll.u32 %s479_s24, 4  ;;  %s23_s25 = int_to_ptr.vmem [resolvable:$true] %s22_s25 }
   0x3   :  { %s443_s26 = scalar_lea.vmem %s23_s25, 640  ;;  %p448_p1 = scmp.lt.s32.totalorder %s23_s25, %s23_s25 }
   0x4   :  { %p444_p0 = scmp.ne.s32.totalorder %s23_s25, %s443_s26  ;;  %p449_p2 = scmp.lt.s32.totalorder %s443_s26, %s443_s26 }
   0x6   :  { %p450_p3 = por %p449_p2, %p448_p1 }
   0x8   :  { %p451_p4 = pnand %p450_p3, %p444_p0 }
   0xa   :  { %454 = shalt.err (!%p451_p4)
}
   0xb   :  { %s480_s27 = smov 64   ;;  %s481_s28 = smov 4  }
   0xc   :  { %28 = dma.hbm_to_vmem [thread:$0]  %s574_s1, 640, %s23_s25, [#allocation4], %s480_s27, %s480_s27, %s481_s28  }
   0xd   :  { %475 = dma.done.wait [#allocation4], 640  }
   0xe   :  { %476 = vsyncadd [#allocation4], 4294966656  ;;  %v482_v0 = vmov 0.0   ;;  %vm483_vm0 = vmmov 0   ;;  %v422_v1 = vld [vmem:[#allocation3 + $0x20] sm:$0xff]   ;;  %v423_v2 = vld [vmem:[#allocation3 + $0x18] sm:$0xff]   ;;  %v256_v34 = vstv %s579_s6 }
   0xf   :  { %377 = vmatprep.subr.bf16.mxu0 %v482_v0  ;;  %387 = vmatprep.mubr.msk.bf16.mxu0 %vm483_vm0, %v482_v0  ;;  %v424_v3 = vld [vmem:[#allocation3 + $0x10] sm:$0xff]   ;;  %v427_v4 = vld [vmem:[%s576_s3 + $0x38] sm:$0xff]   ;;  %v425_v6 = vld [vmem:[#allocation3 + $0x8] sm:$0xff]   ;;  %vm92_vm1 = vcmask 654336   ;;  %s484_s30 = smov [#allocation6]   ;;  %vm327_vm4 = vcmask 24576  }
  0x10   :  { %391 = vmatprep.subr.bf16.mxu1 %v482_v0  ;;  %407 = vmatprep.mubr.msk.bf16.mxu1 %vm483_vm0, %v482_v0  ;;  %v428_v5 = vld [vmem:[%s576_s3 + $0x30] sm:$0xff]   ;;  %v429_v7 = vld [vmem:[%s576_s3 + $0x28] sm:$0xff]   ;;  %v426_v8 = vld [vmem:[#allocation3] sm:$0xff]  }
  0x11   :  { %378 = vmatpush3.bf16.msra.mxu0 %v422_v1  ;;  %392 = vmatpush3.bf16.msra.mxu1 %v427_v4  ;;  %v43_v9 = vld [vmem:[%s573_s0] sm:$0xf]  ;;  %v431_v12 = vld [vmem:[%s576_s3 + $0x18] sm:$0xff]   ;;  %v432_v13 = vld [vmem:[%s576_s3 + $0x10] sm:$0xff]  }
  0x12   :  { %379 = vmatprep.subr.bf16.mxu0 %v482_v0  ;;  %393 = vmatprep.subr.bf16.mxu1 %v482_v0  ;;  %v430_v10 = vld [vmem:[%s576_s3 + $0x20] sm:$0xff]   ;;  %v44_v11 = vpack.c.bf16 %v43_v9, %v43_v9  ;;  %v433_v14 = vld [vmem:[%s576_s3 + $0x8] sm:$0xff]  }
  0x13   :  { %v434_v15 = vld [vmem:[%s576_s3] sm:$0xff]  }
  0x14   :  { %v344_v16 = vld [vmem:[%s575_s2] ss:$0 sm:$0xff] }
  0x15   :  { %380 = vmatpush3.bf16.msra.mxu0 %v423_v2  ;;  %394 = vmatpush3.bf16.msra.mxu1 %v428_v5  ;;  %v351_v25 = vld [vmem:[%s577_s4] ss:$0 sm:$0xff]  ;;  %s335_s4 = sshll.u32 %s484_s30, 4  ;;  %s336_s4 = int_to_ptr.vmem [resolvable:$true] %s335_s4 }
  0x16   :  { %381 = vmatprep.subr.bf16.mxu0 %v482_v0  ;;  %395 = vmatprep.subr.bf16.mxu1 %v482_v0  ;;  %v254_v33 = vld [vmem:[%s578_s5] sm:$0x1]  ;;  %s455_s8 = scalar_lea.vmem %s336_s4, 16  ;;  %s459_s9 = scalar_lea.vmem %s336_s4, 32 }
  0x17   :  { %p456_p5 = scmp.ne.s32.totalorder %s336_s4, %s455_s8  ;;  %p460_p6 = scmp.lt.s32.totalorder %s336_s4, %s336_s4 }
  0x18   :  { %p461_p7 = scmp.lt.s32.totalorder %s459_s9, %s455_s8 }
  0x19   :  { %382 = vmatpush3.bf16.msra.mxu0 %v424_v3  ;;  %396 = vmatpush3.bf16.msra.mxu1 %v429_v7 }
  0x1a   :  { %383 = vmatprep.subr.bf16.mxu0 %v482_v0  ;;  %397 = vmatprep.subr.bf16.mxu1 %v482_v0  ;;  %p462_p8 = por %p461_p7, %p460_p6 }
  0x1c   :  { %p463_p9 = pnand %p462_p8, %p456_p5 }
  0x1d   :  { %384 = vmatpush3.bf16.msra.mxu0 %v425_v6  ;;  %398 = vmatpush3.bf16.msra.mxu1 %v430_v10 }
  0x1e   :  { %385 = vmatprep.subr.bf16.mxu0 %v482_v0  ;;  %399 = vmatprep.subr.bf16.mxu1 %v482_v0 }
  0x21   :  { %386 = vmatpush3.bf16.msra.mxu0 %v426_v8  ;;  %400 = vmatpush3.bf16.msra.mxu1 %v431_v12 }
  0x22   :  { %411 = vmatprep.subr.mxu0 %v482_v0  ;;  %401 = vmatprep.subr.bf16.mxu1 %v482_v0 }
  0x24   :  { %388 = vmatmul.mubr.msk.bf16.vlgmr.msra.gmra.mxu0 %vm92_vm1, %v44_v11 }
  0x25   :  { %413 = vmatprep.mubr.msk.f32.mxu0 %vm483_vm0, %v482_v0  ;;  %402 = vmatpush3.bf16.msra.mxu1 %v432_v13 }
  0x26   :  { %403 = vmatprep.subr.bf16.mxu1 %v482_v0 }
  0x29   :  { %404 = vmatpush3.bf16.msra.mxu1 %v433_v14 }
  0x2a   :  { %405 = vmatprep.subr.bf16.mxu1 %v482_v0 }
  0x2d   :  { %406 = vmatpush3.bf16.msra.mxu1 %v434_v15 }
  0xe4   :  { %v130_v17 = vpop.f32.mrf.mxu0 }
  0xe5   :  { %v131_v18 = vadd.f32 %v344_v16, %v130_v17 }
  0xe6   :  { %v389_v19 = vpop.f32.mrf.mxu0 }
  0xe7   :  { %vm136_vm2 = vcmp.ge.f32.partialorder %v131_v18, 0.0  ;;  %v137_v20 = vmul.f32 0.2, %v131_v18 }
  0xe8   :  { %v133_v21 = vpop.f32.mrf.mxu0 }
  0xe9   :  { %v138_v22 = vsel %vm136_vm2, %v131_v18, %v137_v20 }
  0xea   :  { %v390_v23 = vpop.f32.mrf.mxu0  ;;  %v139_v24 = vpack.c.bf16 %v138_v22, %v138_v22 }
  0xec   :  { %408 = vmatmul.mubr.bf16.vlgmr.msra.gmra.mxu1 %v139_v24 }
 0x1ac   :  { %v245_v26 = vpop.f32.mrf.mxu1 }
 0x1ad   :  { %v246_v27 = vadd.f32 %v351_v25, %v245_v26 }
 0x1ae   :  { %v409_v28 = vpop.f32.mrf.mxu1 }
 0x1af   :  { %vm251_vm3 = vcmp.ge.f32.partialorder %v246_v27, 0.0  ;;  %v252_v29 = vmul.f32 0.2, %v246_v27 }
 0x1b0   :  { %v248_v30 = vpop.f32.mrf.mxu1 }
 0x1b1   :  { %v253_v31 = vsel %vm251_vm3, %v246_v27, %v252_v29 }
 0x1b2   :  { %v410_v32 = vpop.f32.mrf.mxu1  ;;  %412 = vmatpush3.xpose.msra.mxu0 %v253_v31 }
 0x1b5   :  { %414 = vmatmul.mubr.f32.vlgmr.msra.gmra.mxu0 %v254_v33 }
 0x275   :  { %v323_v35 = vpop.f32.mrf.mxu0 }
 0x276   :  { %v324_v36 = vadd.f32 %v323_v35, %v256_v34 }
 0x277   :  { %v415_v37 = vpop.f32.mrf.mxu0 }
 0x278   :  { %328 = vst.msk [vmem:[#allocation6] sm:$0x1] %vm327_vm4, %v324_v36 }
 0x279   :  { %466 = shalt.err (!%p463_p9)
}
 0x27a   :  { %338 = dma.vmem_to_hbm [thread:$0]  %s336_s4, 16, %s580_s7, [#allocation5]  }
 0x27b   :  { %477 = dma.done.wait [#allocation5], 16  }
 0x27c   :  { %478 = vsyncadd [#allocation5], 4294967280 }
 0x27d   :  { %342 = vsyncpa [#allocation4], 1 }
 0x27e   :  { %343 = vsyncpa [#allocation5], 1 }

</bundles_post_ra>
